<compile_context>
chip_gen: v7x
topology: tpu7x:2x2x1
jax: 0.10.0
libtpu: 0.0.40
codegen_flags: <defaults>
</compile_context>

<pallas_src>
import functools

import jax
import jax.numpy as jnp
from jax import lax
from jax.experimental import pallas as pl
from jax.experimental.pallas import tpu as pltpu

F_IN = 6
F_PAD = 8          # contraction dim padded for clean MXU/DMA layout
H1 = 16
H2 = 16
F_OUT = 1
LANE = 128


def _cdiv(a: int, b: int) -> int:
    return (a + b - 1) // b


def _round_up(n: int, m: int) -> int:
    return _cdiv(n, m) * m


def _ggn_kernel(x_ref, w1_ref, b1_ref, w2_ref, b2_ref, w3_ref, b3_ref, o_ref,
                *, chunk):
    bt = x_ref.shape[1]
    num_chunks = bt // chunk

    # Weights stay resident in VMEM across grid steps (constant index_maps).
    # Load once; hoist the bias broadcasts out of the chunk loop (JAX does
    # not CSE broadcast_in_dim).
    w1 = w1_ref[...]                                    # bf16 [H1, F_PAD]
    w2 = w2_ref[...]                                    # bf16 [H2, H1]
    w3 = w3_ref[...]                                    # bf16 [F_OUT, H2]
    b1 = jnp.broadcast_to(b1_ref[...], (H1, chunk))     # f32
    b2 = jnp.broadcast_to(b2_ref[...], (H2, chunk))
    b3 = jnp.broadcast_to(b3_ref[...], (F_OUT, chunk))

    def body(c, carry):
        off = pl.multiple_of(c * chunk, chunk)
        xb = x_ref[:, pl.ds(off, chunk)]                # bf16 [F_PAD, chunk]
        # bf16 operands, f32 accumulation on the MXU.  Chunking the lane
        # axis lets EUP tanh / VPU bias+cast work overlap the vmatmul
        # pushes (the binding slot) of neighbouring chunks.
        h1 = jnp.tanh(
            jnp.dot(w1, xb, preferred_element_type=jnp.float32) + b1)
        h2 = jnp.tanh(
            jnp.dot(w2, h1.astype(jnp.bfloat16),
                    preferred_element_type=jnp.float32) + b2)
        # Layer 3 (M=1, K=16) stays on the MXU: a single bf16 push; the
        # VPU+XLU sublane-reduce alternative would consume the same
        # vector-extended slot.
        y = jnp.tanh(
            jnp.dot(w3, h2.astype(jnp.bfloat16),
                    preferred_element_type=jnp.float32) + b3)
        o_ref[:, pl.ds(off, chunk)] = y.astype(o_ref.dtype)
        return carry

    lax.fori_loop(0, num_chunks, body, 0,
                  unroll=num_chunks if num_chunks <= 8 else 8)


@functools.partial(jax.jit, static_argnames=("block_b",))
def group_genome_forward(ob, w1, b1, w2, b2, w3, b3, *, block_b=16384):
    """ob: [B, 6] f32; torch-layout params:
       w1 [16,6], b1 [16], w2 [16,16], b2 [16], w3 [1,16], b3 [1]
       Returns [B, 1] f32 == tanh(L3(tanh(L2(tanh(L1(ob_scaled)))))).
       block_b=16384 is safe on v5e's scoped VMEM; 32768+ is fine on
       v6e/v7x."""
    B, f_in = ob.shape
    assert f_in == F_IN

    # --- parameter prep (tiny; fused by XLA) -----------------------------
    # Fold the column rescale (ob[:,0]/32, ob[:,2]/50) into layer-1 weights,
    # pad the contraction dim 6 -> 8, cast matmul operands to bf16 (f32
    # accumulation stays via preferred_element_type).
    w1f = w1.at[:, 0].divide(32.0).at[:, 2].divide(50.0)
    w1p = jnp.pad(w1f, ((0, 0), (0, F_PAD - F_IN))).astype(jnp.bfloat16)
    w2b = w2.astype(jnp.bfloat16)
    w3b = w3.astype(jnp.bfloat16)
    b1c = b1.reshape(H1, 1).astype(jnp.float32)
    b2c = b2.reshape(H2, 1).astype(jnp.float32)
    b3c = b3.reshape(F_OUT, 1).astype(jnp.float32)

    # --- activations: feature-major, batch on lanes, bf16 ----------------
    # TODO(synk): producer should emit ob feature-major ([6, B]) so this
    # transpose (an extra HBM round trip) disappears.
    b_pad = _round_up(B, LANE)                    # lane multiple only
    x = jnp.pad(ob.T.astype(jnp.bfloat16),
                ((0, F_PAD - F_IN), (0, b_pad - B)))    # [F_PAD, b_pad]

    # --- tile selection ----------------------------------------------------
    n_tiles = _cdiv(b_pad, block_b)
    if n_tiles > 1 and n_tiles % 2 == 1:
        n_tiles += 1          # even tile count: balanced across v7x's 2 TCs
    bt = _round_up(_cdiv(b_pad, n_tiles), LANE)
    # In-kernel lane sub-chunk (layer interleave); must divide bt.
    if bt % 512 == 0:
        chunk = 512
    elif bt % 256 == 0:
        chunk = 256
    else:
        chunk = 128
    grid = (_cdiv(b_pad, bt),)                    # partial final tile OK

    out = pl.pallas_call(
        functools.partial(_ggn_kernel, chunk=chunk),
        out_shape=jax.ShapeDtypeStruct((1, b_pad), jnp.float32),
        grid_spec=pltpu.PrefetchScalarGridSpec(
            num_scalar_prefetch=0,
            grid=grid,
            in_specs=[
                pl.BlockSpec((F_PAD, bt), lambda i: (0, i)),    # activations
                pl.BlockSpec((H1, F_PAD), lambda i: (0, 0)),    # w1 (resident)
                pl.BlockSpec((H1, 1), lambda i: (0, 0)),        # b1
                pl.BlockSpec((H2, H1), lambda i: (0, 0)),       # w2
                pl.BlockSpec((H2, 1), lambda i: (0, 0)),        # b2
                pl.BlockSpec((F_OUT, H2), lambda i: (0, 0)),    # w3
                pl.BlockSpec((F_OUT, 1), lambda i: (0, 0)),     # b3
            ],
            out_specs=pl.BlockSpec((1, bt), lambda i: (0, i)),  # lane-dense
        ),
        compiler_params=pltpu.CompilerParams(
            dimension_semantics=("parallel",)),
        cost_estimate=pl.CostEstimate(
            flops=2 * (F_PAD * H1 + H1 * H2 + H2 * F_OUT) * b_pad,
            transcendentals=(H1 + H2 + F_OUT) * b_pad,
            bytes_accessed=(F_PAD * 2 + 4) * b_pad),
    )(x, w1p, b1c, w2b, b2c, w3b, b3c)

    # [1, b_pad] -> [B, 1] (reshape of the contiguous slab + slice).
    return out[0, :B].reshape(B, 1)


def _reference_f32(ob, w1, b1, w2, b2, w3, b3):
    ob = ob.at[:, 0].divide(32.0).at[:, 2].divide(50.0)
    h1 = jnp.tanh(ob @ w1.T + b1[None, :])
    h2 = jnp.tanh(h1 @ w2.T + b2[None, :])
    return jnp.tanh(h2 @ w3.T + b3[None, :])


def _reference_bf16(ob, w1, b1, w2, b2, w3, b3):
    # Matched-precision reference: same scale fold + bf16 operand casts,
    # f32 accumulation.
    w1f = (w1.at[:, 0].divide(32.0).at[:, 2].divide(50.0)).astype(jnp.bfloat16)
    x = ob.astype(jnp.bfloat16)
    h1 = jnp.tanh(jnp.dot(x, w1f.T, preferred_element_type=jnp.float32)
                  + b1[None, :])
    h2 = jnp.tanh(jnp.dot(h1.astype(jnp.bfloat16), w2.astype(jnp.bfloat16).T,
                          preferred_element_type=jnp.float32) + b2[None, :])
    return jnp.tanh(jnp.dot(h2.astype(jnp.bfloat16), w3.astype(jnp.bfloat16).T,
                            preferred_element_type=jnp.float32) + b3[None, :])


if __name__ == "__main__":
    key = jax.random.PRNGKey(0)
    k_x, k1w, k1b, k2w, k2b, k3w, k3b, k_x2 = jax.random.split(key, 8)

    # Deterministic params matching torch.nn.Linear shapes/init bounds.
    def uinit(k, shape, fan_in):
        bound = 1.0 / jnp.sqrt(jnp.float32(fan_in))
        return jax.random.uniform(k, shape, dtype=jnp.float32,
                                  minval=-bound, maxval=bound)

    w1 = uinit(k1w, (H1, F_IN), F_IN)
    b1 = uinit(k1b, (H1,), F_IN)
    w2 = uinit(k2w, (H2, H1), H1)
    b2 = uinit(k2b, (H2,), H1)
    w3 = uinit(k3w, (F_OUT, H2), H2)
    b3 = uinit(k3b, (F_OUT,), H2)

    def check(ob, block_b):
        out = group_genome_forward(ob, w1, b1, w2, b2, w3, b3,
                                   block_b=block_b)
        out = jax.block_until_ready(out)
        B = ob.shape[0]
        assert out.shape == (B, F_OUT), out.shape
        ref32 = _reference_f32(ob, w1, b1, w2, b2, w3, b3)
        refbf = _reference_bf16(ob, w1, b1, w2, b2, w3, b3)
        # Tight vs matched-precision reference; loose vs exact f32
        # (bf16 operands => ~1e-3 relative error, renegotiated tolerance).
        assert jnp.allclose(out, refbf, atol=2e-3, rtol=2e-3), \
            float(jnp.max(jnp.abs(out - refbf)))
        assert jnp.allclose(out, ref32, atol=5e-2, rtol=5e-2), \
            float(jnp.max(jnp.abs(out - ref32)))

    # Small canonical case.
    ob_small = jax.random.normal(k_x, (8, F_IN), dtype=jnp.float32) * 10.0
    check(ob_small, block_b=16384)

    # Non-multiple batch with multiple tiles + partial final tile
    # (exercises padding, even-grid selection and the chunk loop).
    ob_odd = jax.random.normal(k_x2, (300, F_IN), dtype=jnp.float32) * 10.0
    check(ob_odd, block_b=256)

    print("KERNEL_OK")
</pallas_src>

<mosaic_0001>
module attributes {stable_mosaic.version = 11 : i64} {
  func.func @_ggn_kernel(%arg0: i32, %arg1: memref<8x128xbf16, #tpu.memory_space<vmem>>, %arg2: memref<16x8xbf16, #tpu.memory_space<vmem>>, %arg3: memref<16x1xf32, #tpu.memory_space<vmem>>, %arg4: memref<16x16xbf16, #tpu.memory_space<vmem>>, %arg5: memref<16x1xf32, #tpu.memory_space<vmem>>, %arg6: memref<1x16xbf16, #tpu.memory_space<vmem>>, %arg7: memref<1x1xf32, #tpu.memory_space<vmem>>, %arg8: memref<1x128xf32, #tpu.memory_space<vmem>>) attributes {dimension_semantics = [#tpu.dimension_semantics<parallel>], iteration_bounds = array<i64: 1>, scalar_prefetch = 0 : i64, scratch_operands = 0 : i64, tpu.core_type = #tpu.core_type<tc>, window_params = [{transform_indices = @transform_0, window_bounds = array<i64: 8, 128>}, {pipeline_mode = #tpu.pipeline_mode<synchronous>, transform_indices = @transform_1, window_bounds = array<i64: 16, 8>}, {pipeline_mode = #tpu.pipeline_mode<synchronous>, transform_indices = @transform_2, window_bounds = array<i64: 16, 1>}, {pipeline_mode = #tpu.pipeline_mode<synchronous>, transform_indices = @transform_3, window_bounds = array<i64: 16, 16>}, {pipeline_mode = #tpu.pipeline_mode<synchronous>, transform_indices = @transform_4, window_bounds = array<i64: 16, 1>}, {pipeline_mode = #tpu.pipeline_mode<synchronous>, transform_indices = @transform_5, window_bounds = array<i64: 1, 16>}, {pipeline_mode = #tpu.pipeline_mode<synchronous>, transform_indices = @transform_6, window_bounds = array<i64: 1, 1>}, {transform_indices = @transform_7, window_bounds = array<i64: 1, 128>}]} {
    %c0 = arith.constant 0 : index
    %c0_0 = arith.constant 0 : index
    %0 = vector.load %arg2[%c0, %c0_0] : memref<16x8xbf16, #tpu.memory_space<vmem>>, vector<16x8xbf16>
    %c0_1 = arith.constant 0 : index
    %c0_2 = arith.constant 0 : index
    %1 = vector.load %arg4[%c0_1, %c0_2] : memref<16x16xbf16, #tpu.memory_space<vmem>>, vector<16x16xbf16>
    %c0_3 = arith.constant 0 : index
    %c0_4 = arith.constant 0 : index
    %2 = vector.load %arg6[%c0_3, %c0_4] : memref<1x16xbf16, #tpu.memory_space<vmem>>, vector<1x16xbf16>
    %c0_5 = arith.constant 0 : index
    %c0_6 = arith.constant 0 : index
    %3 = vector.load %arg3[%c0_5, %c0_6] : memref<16x1xf32, #tpu.memory_space<vmem>>, vector<16x1xf32>
    %4 = vector.shape_cast %3 : vector<16x1xf32> to vector<16x1xf32>
    %5 = vector.broadcast %4 : vector<16x1xf32> to vector<16x128xf32>
    %c0_7 = arith.constant 0 : index
    %c0_8 = arith.constant 0 : index
    %6 = vector.load %arg5[%c0_7, %c0_8] : memref<16x1xf32, #tpu.memory_space<vmem>>, vector<16x1xf32>
    %7 = vector.shape_cast %6 : vector<16x1xf32> to vector<16x1xf32>
    %8 = vector.broadcast %7 : vector<16x1xf32> to vector<16x128xf32>
    %c0_9 = arith.constant 0 : index
    %c0_10 = arith.constant 0 : index
    %9 = vector.load %arg7[%c0_9, %c0_10] : memref<1x1xf32, #tpu.memory_space<vmem>>, vector<1x1xf32>
    %10 = vector.shape_cast %9 : vector<1x1xf32> to vector<1x1xf32>
    %11 = vector.broadcast %10 : vector<1x1xf32> to vector<1x128xf32>
    %c0_i32 = arith.constant 0 : i32
    %c128_i32 = arith.constant 128 : i32
    %12 = arith.muli %c0_i32, %c128_i32 : i32
    %13 = tpu.assume_multiple %12, 128 : i32
    %c0_11 = arith.constant 0 : index
    %14 = arith.index_cast %13 : i32 to index
    %15 = vector.load %arg1[%c0_11, %14] : memref<8x128xbf16, #tpu.memory_space<vmem>>, vector<8x128xbf16>
    %cst = arith.constant dense<0.000000e+00> : vector<16x128xf32>
    %16 = tpu.matmul %0, %15, %cst {dimension_numbers = #tpu.dot_dimension_numbers<[1], [0], [0], [1], [0, 0, 1, 1], [], []>} : vector<16x8xbf16>, vector<8x128xbf16>, vector<16x128xf32> -> vector<16x128xf32>
    %17 = arith.addf %16, %5 : vector<16x128xf32>
    %18 = math.tanh %17 : vector<16x128xf32>
    %19 = arith.truncf %18 : vector<16x128xf32> to vector<16x128xbf16>
    %cst_12 = arith.constant dense<0.000000e+00> : vector<16x128xf32>
    %20 = tpu.matmul %1, %19, %cst_12 {dimension_numbers = #tpu.dot_dimension_numbers<[1], [0], [0], [1], [0, 0, 1, 1], [], []>} : vector<16x16xbf16>, vector<16x128xbf16>, vector<16x128xf32> -> vector<16x128xf32>
    %21 = arith.addf %20, %8 : vector<16x128xf32>
    %22 = math.tanh %21 : vector<16x128xf32>
    %23 = arith.truncf %22 : vector<16x128xf32> to vector<16x128xbf16>
    %cst_13 = arith.constant dense<0.000000e+00> : vector<1x128xf32>
    %24 = tpu.matmul %2, %23, %cst_13 {dimension_numbers = #tpu.dot_dimension_numbers<[1], [0], [0], [1], [0, 0, 1, 1], [], []>} : vector<1x16xbf16>, vector<16x128xbf16>, vector<1x128xf32> -> vector<1x128xf32>
    %25 = arith.addf %24, %11 : vector<1x128xf32>
    %26 = math.tanh %25 : vector<1x128xf32>
    %c0_14 = arith.constant 0 : index
    %27 = arith.index_cast %13 : i32 to index
    %28 = vector.load %arg8[%c0_14, %27] : memref<1x128xf32, #tpu.memory_space<vmem>>, vector<1x128xf32>
    tpu.vector_store %arg8[%c0_14, %27], %26 {strides = array<i32>} : memref<1x128xf32, #tpu.memory_space<vmem>>, vector<1x128xf32>,
    %c1_i32 = arith.constant 1 : i32
    return
  }
  func.func @transform_0(%arg0: i32) -> (i32, i32) {
    %c0_i32 = arith.constant 0 : i32
    %c0_i32_0 = arith.constant 0 : i32
    return %c0_i32, %arg0 : i32, i32
  }
  func.func @transform_1(%arg0: i32) -> (i32, i32) {
    %c0_i32 = arith.constant 0 : i32
    %c0_i32_0 = arith.constant 0 : i32
    %c0_i32_1 = arith.constant 0 : i32
    return %c0_i32, %c0_i32_0 : i32, i32
  }
  func.func @transform_2(%arg0: i32) -> (i32, i32) {
    %c0_i32 = arith.constant 0 : i32
    %c0_i32_0 = arith.constant 0 : i32
    %c0_i32_1 = arith.constant 0 : i32
    return %c0_i32, %c0_i32_0 : i32, i32
  }
  func.func @transform_3(%arg0: i32) -> (i32, i32) {
    %c0_i32 = arith.constant 0 : i32
    %c0_i32_0 = arith.constant 0 : i32
    %c0_i32_1 = arith.constant 0 : i32
    return %c0_i32, %c0_i32_0 : i32, i32
  }
  func.func @transform_4(%arg0: i32) -> (i32, i32) {
    %c0_i32 = arith.constant 0 : i32
    %c0_i32_0 = arith.constant 0 : i32
    %c0_i32_1 = arith.constant 0 : i32
    return %c0_i32, %c0_i32_0 : i32, i32
  }
  func.func @transform_5(%arg0: i32) -> (i32, i32) {
    %c0_i32 = arith.constant 0 : i32
    %c0_i32_0 = arith.constant 0 : i32
    %c0_i32_1 = arith.constant 0 : i32
    return %c0_i32, %c0_i32_0 : i32, i32
  }
  func.func @transform_6(%arg0: i32) -> (i32, i32) {
    %c0_i32 = arith.constant 0 : i32
    %c0_i32_0 = arith.constant 0 : i32
    %c0_i32_1 = arith.constant 0 : i32
    return %c0_i32, %c0_i32_0 : i32, i32
  }
  func.func @transform_7(%arg0: i32) -> (i32, i32) {
    %c0_i32 = arith.constant 0 : i32
    %c0_i32_0 = arith.constant 0 : i32
    return %c0_i32, %arg0 : i32, i32
  }
}

</mosaic_0001>

<bundles_post_ra>
// kernel: group_genome_forward.1
= control target key start
LH: loop header
LB: loop body
LE: loop exit
PB: predicated region body
PF: predicated region fallthrough
CT: control target
= control target key end

     0   :  { %vm78_vm0 = vcmask 1043456   ;;  %v274_v0 = vmov 0.0   ;;  %vm275_vm1 = vmmov 0   ;;  %vm74_vm2 = vcmask 64512   ;;  %s352_s0 = inlined_call_operand.vmem [shape: bf16[8,128], index: 0, kind: input, shape index: {}]   ;;  %s353_s1 = inlined_call_operand.vmem [shape: bf16[16,8], index: 1, kind: input, shape index: {}]   ;;  %s354_s2 = inlined_call_operand.vmem [shape: f32[16,1], index: 2, kind: input, shape index: {}]   ;;  %s355_s6 = inlined_call_operand.<no memory space> [shape: f32[1,1], index: 6, kind: input, shape index: {}]   ;;  %s356_s3 = inlined_call_operand.vmem [shape: bf16[16,16], index: 3, kind: input, shape index: {}]   ;;  %s357_s4 = inlined_call_operand.vmem [shape: f32[16,1], index: 4, kind: input, shape index: {}]   ;;  %s358_s5 = inlined_call_operand.vmem [shape: bf16[1,16], index: 5, kind: input, shape index: {}]   ;;  %s359_s7 = inlined_call_operand.vmem [shape: f32[1,128], index: 7, kind: output, shape index: {}]  }
   0x1   :  { %239 = vmatprep.subr.bf16.mxu0 %v274_v0  ;;  %v68_v1 = vld [vmem:[%s352_s0] sm:$0xf]  ;;  %241 = vmatprep.mubr.msk.bf16.mxu0 %vm275_vm1, %v274_v0  ;;  %v12_v2 = vstv %s355_s6  ;;  %v276_v6 = vmov 0   ;;  %v35_v7 = vld [vmem:[%s354_s2 + $0x8] sm:$0xff]  ;;  %vm131_vm3 = vcmask 130048   ;;  %v64_v35 = vlaneseq }
   0x2   :  { %v80_v3 = vsel %vm78_vm0, %v68_v1, 0  ;;  %v262_v4 = vld [vmem:[%s353_s1] sm:$0xff]   ;;  %13 = vst [vmem:[#allocation2] sm:$0x1] %v12_v2  ;;  %245 = vmatprep.subr.bf16.mxu1 %v274_v0  ;;  %247 = vmatprep.mubr.msk.bf16.mxu1 %vm275_vm1, %v274_v0  ;;  %v47_v10 = vld [vmem:[%s357_s4 + $0x8] sm:$0xff] }
   0x3   :  { %v34_v5 = vld [vmem:[%s354_s2] sm:$0xff]  ;;  %240 = vmatpush3.bf16.msra.mxu0 %v80_v3  ;;  %260 = vset.pattern.permute.xlu0 %v276_v6  ;;  %v65_v36 = vshrl.u32 %v64_v35, 7 }
   0x4   :  { %38 = vperm.xlu0 %260, %v34_v5   ;;  %261 = vset.pattern.permute.xlu1 %v276_v6  ;;  %v46_v9 = vld [vmem:[%s357_s4] sm:$0xff] }
   0x5   :  { %251 = vmatprep.subr.bf16.mxu0 %v274_v0  ;;  %50 = vperm.xlu1 %261, %v46_v9   ;;  %v263_v22 = vld [vmem:[%s356_s3] sm:$0xff]   ;;  %v66_v37 = vsub.s32 0, %v65_v36 }
   0x6   :  { %242 = vmatmul.mubr.msk.bf16.vlgmr.msra.gmra.mrb[0].mxu0 %vm74_vm2, %v262_v4  ;;  %v33_v34 = vld [vmem:[%s358_s5] sm:$0x1] }
   0x7   :  { %253 = vmatprep.mubr.msk.bf16.mxu0 %vm275_vm1, %v274_v0 }
   0x8   :  { %43 = vperm.xlu0 %260, %v35_v7  }
   0x9   :  { %v58_v8 = vld [vmem:[#allocation2] sm:$0x1]  ;;  %55 = vperm.xlu1 %261, %v47_v10  }
   0xc   :  { %61 = vperm.xlu0 %260, %v58_v8  }
  0x83   :  { %v39_v11 = vpop.permute.xlu0 %38 }
  0x84   :  { %v51_v23 = vpop.permute.xlu1 %50 }
  0x87   :  { %v44_v15 = vpop.permute.xlu0 %43 }
  0x88   :  { %v56_v27 = vpop.permute.xlu1 %55 }
  0x8b   :  { %v62_v38 = vpop.permute.xlu0 %61 }
  0x8c   :  { %v67_v39 = vrot.slane %v62_v38, %v66_v37 }
  0xd9   :  { %v116_v12 = vpop.f32.mrb[0].mxu0 }
  0xda   :  { %v117_v13 = vadd.f32 %v116_v12, %v39_v11  ;;  %v243_v14 = vpop.f32.mrb[1].mxu0 }
  0xdb   :  { %v119_v16 = vpop.f32.mrb[2].mxu0 }
  0xdc   :  { %v120_v17 = vadd.f32 %v119_v16, %v44_v15  ;;  %v244_v18 = vpop.f32.mrb[3].mxu0  ;;  %264 = vtanh.f32 %v117_v13 }
  0xde   :  { %266 = vtanh.f32 %v120_v17 }
  0xe6   :  { %v265_v19 = vpop.eup %264 }
  0xe8   :  { %v267_v20 = vpop.eup %266 }
  0xe9   :  { %v125_v21 = vpack.c.bf16 %v267_v20, %v265_v19 }
  0xeb   :  { %246 = vmatpush3.bf16.msra.mxu1 %v125_v21 }
  0xee   :  { %248 = vmatmul.mubr.msk.bf16.vlgmr.msra.gmra.mrb[0].mxu1 %vm131_vm3, %v263_v22 }
 0x1c1   :  { %v169_v24 = vpop.f32.mrb[0].mxu1 }
 0x1c2   :  { %v170_v25 = vadd.f32 %v169_v24, %v51_v23  ;;  %v249_v26 = vpop.f32.mrb[1].mxu1 }
 0x1c3   :  { %v172_v28 = vpop.f32.mrb[2].mxu1 }
 0x1c4   :  { %v173_v29 = vadd.f32 %v172_v28, %v56_v27  ;;  %v250_v30 = vpop.f32.mrb[3].mxu1  ;;  %268 = vtanh.f32 %v170_v25 }
 0x1c6   :  { %270 = vtanh.f32 %v173_v29 }
 0x1ce   :  { %v269_v31 = vpop.eup %268 }
 0x1d0   :  { %v271_v32 = vpop.eup %270 }
 0x1d1   :  { %v178_v33 = vpack.c.bf16 %v271_v32, %v269_v31 }
 0x1d3   :  { %252 = vmatpush3.bf16.msra.mxu0 %v178_v33 }
 0x1d6   :  { %254 = vmatmul.mubr.msk.bf16.vlgmr.msra.gmra.mrb[4].mxu0 %vm131_vm3, %v33_v34 }
 0x2a9   :  { %v216_v40 = vpop.f32.mrb[4].mxu0 }
 0x2aa   :  { %v217_v41 = vadd.f32 %v216_v40, %v67_v39  ;;  %v255_v42 = vpop.f32.mrb[5].mxu0 }
 0x2ab   :  { %v219_v43 = vpop.f32.mrb[6].mxu0 }
 0x2ac   :  { %272 = vtanh.f32 %v217_v41  ;;  %v256_v44 = vpop.f32.mrb[7].mxu0 }
 0x2b6   :  { %v273_v45 = vpop.eup %272 }
 0x2b7   :  { %223 = vst [vmem:[%s359_s7] sm:$0x1] %v273_v45 }

</bundles_post_ra>
